<compile_context>
chip_gen: v6e
topology: v6e:2x2x1
jax: 0.10.0
libtpu: 0.0.40
codegen_flags: <defaults>
</compile_context>

<pallas_src>
import functools

import jax
import jax.numpy as jnp
from jax.experimental import pallas as pl
from jax.experimental.pallas import tpu as pltpu

IN_DIM = 5 * 12           # 60
LATENT_1 = 32             # fc1 output
HID = 16                  # hidden width of fc21/fc22 and fc3 first layer
LATENT_2 = 8              # latent dim
DEC_HID2 = 32             # fc3 second hidden

XEPS_W = IN_DIM + LATENT_2          # 68 : input slab lanes  [x_flat | eps]
OUT_W = IN_DIM + 2 * LATENT_2       # 76 : output slab lanes [recon | mu | logvar]

# ---- weight slab layout (rows, 128 lanes). Every block starts on an 8-row
# ---- boundary and at lane 0 so static slices never straddle (8,128) tiles.
_W1_R = 0      # (60, 32)  rows   0..59
_W2A_R = 64    # (32, 32)  rows  64..95   fused fc21[0]/fc22[0]
_W2B_R = 96    # (32, 16)  rows  96..127  block-diag fc21[2]/fc22[2]
_W3A_R = 128   # ( 8, 16)  rows 128..135
_W3B_R = 136   # (16, 32)  rows 136..151
_W3C_R = 152   # (32, 60)  rows 152..183
_B_R = 184     # 6 bias rows: b1, b2a, b2b, b3a, b3b, b3c
SLAB_ROWS = 192
SLAB_LANES = 128


def _cdiv(a, b):
    return -(-a // b)


def _round_up(n, m):
    return _cdiv(n, m) * m


def fcvae_kernel(xe_ref, w_ref, out_ref):
    xe = xe_ref[...]                        # (TILE_B, 68)
    x = xe[:, :IN_DIM]                      # (TILE_B, 60)
    eps = xe[:, IN_DIM:]                    # (TILE_B, 8)

    # static slices of the VMEM-resident weight slab
    w1 = w_ref[_W1_R:_W1_R + IN_DIM, :LATENT_1]
    w2a = w_ref[_W2A_R:_W2A_R + LATENT_1, :2 * HID]
    w2b = w_ref[_W2B_R:_W2B_R + 2 * HID, :2 * LATENT_2]
    w3a = w_ref[_W3A_R:_W3A_R + LATENT_2, :HID]
    w3b = w_ref[_W3B_R:_W3B_R + HID, :DEC_HID2]
    w3c = w_ref[_W3C_R:_W3C_R + DEC_HID2, :IN_DIM]
    b1 = w_ref[_B_R + 0:_B_R + 1, :LATENT_1]
    b2a = w_ref[_B_R + 1:_B_R + 2, :2 * HID]
    b2b = w_ref[_B_R + 2:_B_R + 3, :2 * LATENT_2]
    b3a = w_ref[_B_R + 3:_B_R + 4, :HID]
    b3b = w_ref[_B_R + 4:_B_R + 5, :DEC_HID2]
    b3c = w_ref[_B_R + 5:_B_R + 6, :IN_DIM]

    relu = lambda a: jnp.maximum(a, 0.0)
    dot = lambda a, b: jnp.dot(a, b, preferred_element_type=jnp.float32)

    # encoder
    h1 = relu(dot(x, w1) + b1)                         # (TILE_B, 32)
    h2 = relu(dot(h1, w2a) + b2a)                      # (TILE_B, 32) = [h21 | h22]
    mulogvar = dot(h2, w2b) + b2b                      # (TILE_B, 16) = [mu | logvar]
    mu = mulogvar[:, :LATENT_2]
    logvar = mulogvar[:, LATENT_2:]

    # reparameterize: z = mu + eps * exp(0.5 * logvar)
    z = mu + eps * jnp.exp(0.5 * logvar)

    # decoder
    h3 = relu(dot(z, w3a) + b3a)
    h3 = relu(dot(h3, w3b) + b3b)
    recon = relu(dot(h3, w3c) + b3c)                   # (TILE_B, 60)

    # lane-dense 76-wide output tile: [recon | mu | logvar], no zero pad
    out_ref[:, :IN_DIM] = recon.astype(out_ref.dtype)
    out_ref[:, IN_DIM:] = mulogvar.astype(out_ref.dtype)


@functools.partial(jax.jit, static_argnames=("max_tile_b", "min_grid_steps"))
def fcvae_forward(x, eps, weight_slab, *, max_tile_b=2048, min_grid_steps=2):
    """x: (B, 12, 5) f32; eps: (B, 8) f32; weight_slab: (192, 128) f32 from pack_params."""
    B = x.shape[0]
    x_flat = x.reshape(B, IN_DIM)                 # == torch.flatten(x, start_dim=1)
    xe = jnp.concatenate([x_flat, eps.astype(x_flat.dtype)], axis=-1)   # (B, 68)

    # Tile selection: (nearly) evenly divide B so tail padding stays <= 7 rows,
    # keep the tile a multiple of 8 (f32 sublanes), and use >= min_grid_steps
    # grid steps when B allows it (keeps both v7x TensorCores busy).
    n_steps = max(_cdiv(B, max_tile_b), min(min_grid_steps, _cdiv(B, 8)))
    tile_b = _round_up(_cdiv(B, n_steps), 8)
    b_pad = _round_up(B, tile_b)
    if b_pad != B:
        xe = jnp.pad(xe, ((0, b_pad - B), (0, 0)))

    grid = (b_pad // tile_b,)

    slab = pl.pallas_call(
        fcvae_kernel,
        grid=grid,
        out_shape=jax.ShapeDtypeStruct((b_pad, OUT_W), jnp.float32),
        in_specs=[
            pl.BlockSpec((tile_b, XEPS_W), lambda i: (i, 0)),          # [x | eps] tile
            pl.BlockSpec((SLAB_ROWS, SLAB_LANES), lambda i: (0, 0)),   # resident weights
        ],
        out_specs=pl.BlockSpec((tile_b, OUT_W), lambda i: (i, 0)),
        compiler_params=pltpu.CompilerParams(
            dimension_semantics=("parallel",)),
        # NOTE: raise max_tile_b to ~4096 together with
        # vmem_limit_bytes=... if you want fewer, larger grid steps.
    )(xe, weight_slab)

    recon = slab[:B, :IN_DIM].reshape(B, 12, 5)   # matches h3.reshape((B, 12, 5))
    mu = slab[:B, IN_DIM:IN_DIM + LATENT_2]
    logvar = slab[:B, IN_DIM + LATENT_2:OUT_W]
    return mu, logvar, recon


def init_params(key):
    """Deterministic init mimicking PyTorch Linear default: U(-1/sqrt(fan_in), +).

    Returned in the un-fused (per-Linear) layout matching the PyTorch module,
    with weights stored (in_features, out_features): y = x @ W + b.
    """
    def linear(key, fan_in, fan_out):
        kw, kb = jax.random.split(key)
        bound = 1.0 / jnp.sqrt(jnp.float32(fan_in))
        w = jax.random.uniform(kw, (fan_in, fan_out), jnp.float32, -bound, bound)
        b = jax.random.uniform(kb, (1, fan_out), jnp.float32, -bound, bound)
        return w, b

    keys = jax.random.split(key, 8)
    params = {}
    params["w1"], params["b1"] = linear(keys[0], IN_DIM, LATENT_1)
    params["w21a"], params["b21a"] = linear(keys[1], LATENT_1, HID)
    params["w21b"], params["b21b"] = linear(keys[2], HID, LATENT_2)
    params["w22a"], params["b22a"] = linear(keys[3], LATENT_1, HID)
    params["w22b"], params["b22b"] = linear(keys[4], HID, LATENT_2)
    params["w3a"], params["b3a"] = linear(keys[5], LATENT_2, HID)
    params["w3b"], params["b3b"] = linear(keys[6], HID, DEC_HID2)
    params["w3c"], params["b3c"] = linear(keys[7], DEC_HID2, IN_DIM)
    return params


def pack_params(params):
    """One-time fusion of fc21/fc22 + packing of all weights into one (192,128) slab."""
    # fused first layers: h1 @ [w21a | w22a] -> [h21 | h22]
    w2a = jnp.concatenate([params["w21a"], params["w22a"]], axis=1)     # (32, 32)
    b2a = jnp.concatenate([params["b21a"], params["b22a"]], axis=1)     # (1, 32)
    # block-diagonal second layers: [h21|h22] @ blkdiag(w21b, w22b) -> [mu|logvar]
    w2b = jnp.zeros((2 * HID, 2 * LATENT_2), jnp.float32)
    w2b = w2b.at[:HID, :LATENT_2].set(params["w21b"])
    w2b = w2b.at[HID:, LATENT_2:].set(params["w22b"])
    b2b = jnp.concatenate([params["b21b"], params["b22b"]], axis=1)     # (1, 16)

    slab = jnp.zeros((SLAB_ROWS, SLAB_LANES), jnp.float32)

    def put(s, row, w):
        r, c = w.shape
        return s.at[row:row + r, :c].set(w)

    slab = put(slab, _W1_R, params["w1"])
    slab = put(slab, _W2A_R, w2a)
    slab = put(slab, _W2B_R, w2b)
    slab = put(slab, _W3A_R, params["w3a"])
    slab = put(slab, _W3B_R, params["w3b"])
    slab = put(slab, _W3C_R, params["w3c"])
    for i, b in enumerate([params["b1"], b2a, b2b,
                           params["b3a"], params["b3b"], params["b3c"]]):
        slab = put(slab, _B_R + i, b)
    return slab


def fcvae_reference(x, eps, params):
    """Pure-JAX reference (un-fused) for correctness check."""
    B = x.shape[0]
    xf = x.reshape(B, IN_DIM)
    relu = lambda a: jnp.maximum(a, 0.0)
    h1 = relu(xf @ params["w1"] + params["b1"])
    mu = relu(h1 @ params["w21a"] + params["b21a"]) @ params["w21b"] + params["b21b"]
    logvar = relu(h1 @ params["w22a"] + params["b22a"]) @ params["w22b"] + params["b22b"]
    z = mu + eps * jnp.exp(0.5 * logvar)
    h3 = relu(z @ params["w3a"] + params["b3a"])
    h3 = relu(h3 @ params["w3b"] + params["b3b"])
    recon = relu(h3 @ params["w3c"] + params["b3c"])
    return mu, logvar, recon.reshape(B, 12, 5)


if __name__ == "__main__":
    key = jax.random.PRNGKey(0)
    k_params, k_x, k_eps = jax.random.split(key, 3)

    params = init_params(k_params)
    weight_slab = pack_params(params)   # fuse + pack once, outside the jitted forward

    # --- small demo batch ---------------------------------------------------
    B = 2
    x = jax.random.normal(k_x, (B, 12, 5), jnp.float32)
    # eps for reparameterization (torch.randn_like) is drawn outside the kernel
    # so the forward pass is deterministic: z = mu + eps * std.
    eps = jax.random.normal(k_eps, (B, LATENT_2), jnp.float32)

    mu, logvar, recon = fcvae_forward(x, eps, weight_slab)
    jax.block_until_ready((mu, logvar, recon))

    mu_r, logvar_r, recon_r = fcvae_reference(x, eps, params)
    assert mu.shape == (B, LATENT_2)
    assert logvar.shape == (B, LATENT_2)
    assert recon.shape == (B, 12, 5)
    assert jnp.allclose(mu, mu_r, atol=1e-5)
    assert jnp.allclose(logvar, logvar_r, atol=1e-5)
    assert jnp.allclose(recon, recon_r, atol=1e-5)

    # --- ragged batch, multiple grid steps (exercises tiling + tail padding) --
    B2 = 19
    k_x2, k_e2 = jax.random.split(jax.random.PRNGKey(1))
    x2 = jax.random.normal(k_x2, (B2, 12, 5), jnp.float32)
    eps2 = jax.random.normal(k_e2, (B2, LATENT_2), jnp.float32)
    mu2, lv2, rec2 = fcvae_forward(x2, eps2, weight_slab, max_tile_b=8)
    jax.block_until_ready((mu2, lv2, rec2))
    mu2_r, lv2_r, rec2_r = fcvae_reference(x2, eps2, params)
    assert jnp.allclose(mu2, mu2_r, atol=1e-5)
    assert jnp.allclose(lv2, lv2_r, atol=1e-5)
    assert jnp.allclose(rec2, rec2_r, atol=1e-5)

    print("KERNEL_OK")
</pallas_src>

<mosaic_0001>
module attributes {stable_mosaic.version = 11 : i64} {
  func.func @fcvae_kernel(%arg0: i32, %arg1: memref<8x68xf32, #tpu.memory_space<vmem>>, %arg2: memref<192x128xf32, #tpu.memory_space<vmem>>, %arg3: memref<8x76xf32, #tpu.memory_space<vmem>>) attributes {dimension_semantics = [#tpu.dimension_semantics<parallel>], iteration_bounds = array<i64: 1>, scalar_prefetch = 0 : i64, scratch_operands = 0 : i64, tpu.core_type = #tpu.core_type<tc>, window_params = [{transform_indices = @transform_0, window_bounds = array<i64: 8, 68>}, {pipeline_mode = #tpu.pipeline_mode<synchronous>, transform_indices = @transform_1, window_bounds = array<i64: 192, 128>}, {transform_indices = @transform_2, window_bounds = array<i64: 8, 76>}]} {
    %c0 = arith.constant 0 : index
    %c0_0 = arith.constant 0 : index
    %0 = vector.load %arg1[%c0, %c0_0] : memref<8x68xf32, #tpu.memory_space<vmem>>, vector<8x68xf32>
    %1 = vector.extract_strided_slice %0 {offsets = [0, 0], sizes = [8, 60], strides = [1, 1]} : vector<8x68xf32> to vector<8x60xf32>
    %2 = vector.extract_strided_slice %0 {offsets = [0, 60], sizes = [8, 8], strides = [1, 1]} : vector<8x68xf32> to vector<8x8xf32>
    %c0_1 = arith.constant 0 : index
    %c0_2 = arith.constant 0 : index
    %3 = vector.load %arg2[%c0_1, %c0_2] : memref<192x128xf32, #tpu.memory_space<vmem>>, vector<60x32xf32>
    %c64 = arith.constant 64 : index
    %c0_3 = arith.constant 0 : index
    %4 = vector.load %arg2[%c64, %c0_3] : memref<192x128xf32, #tpu.memory_space<vmem>>, vector<32x32xf32>
    %c96 = arith.constant 96 : index
    %c0_4 = arith.constant 0 : index
    %5 = vector.load %arg2[%c96, %c0_4] : memref<192x128xf32, #tpu.memory_space<vmem>>, vector<32x16xf32>
    %c128 = arith.constant 128 : index
    %c0_5 = arith.constant 0 : index
    %6 = vector.load %arg2[%c128, %c0_5] : memref<192x128xf32, #tpu.memory_space<vmem>>, vector<8x16xf32>
    %c136 = arith.constant 136 : index
    %c0_6 = arith.constant 0 : index
    %7 = vector.load %arg2[%c136, %c0_6] : memref<192x128xf32, #tpu.memory_space<vmem>>, vector<16x32xf32>
    %c152 = arith.constant 152 : index
    %c0_7 = arith.constant 0 : index
    %8 = vector.load %arg2[%c152, %c0_7] : memref<192x128xf32, #tpu.memory_space<vmem>>, vector<32x60xf32>
    %c184 = arith.constant 184 : index
    %c0_8 = arith.constant 0 : index
    %9 = vector.load %arg2[%c184, %c0_8] : memref<192x128xf32, #tpu.memory_space<vmem>>, vector<1x32xf32>
    %c185 = arith.constant 185 : index
    %c0_9 = arith.constant 0 : index
    %10 = vector.load %arg2[%c185, %c0_9] : memref<192x128xf32, #tpu.memory_space<vmem>>, vector<1x32xf32>
    %c186 = arith.constant 186 : index
    %c0_10 = arith.constant 0 : index
    %11 = vector.load %arg2[%c186, %c0_10] : memref<192x128xf32, #tpu.memory_space<vmem>>, vector<1x16xf32>
    %c187 = arith.constant 187 : index
    %c0_11 = arith.constant 0 : index
    %12 = vector.load %arg2[%c187, %c0_11] : memref<192x128xf32, #tpu.memory_space<vmem>>, vector<1x16xf32>
    %c188 = arith.constant 188 : index
    %c0_12 = arith.constant 0 : index
    %13 = vector.load %arg2[%c188, %c0_12] : memref<192x128xf32, #tpu.memory_space<vmem>>, vector<1x32xf32>
    %c189 = arith.constant 189 : index
    %c0_13 = arith.constant 0 : index
    %14 = vector.load %arg2[%c189, %c0_13] : memref<192x128xf32, #tpu.memory_space<vmem>>, vector<1x60xf32>
    %cst = arith.constant dense<0.000000e+00> : vector<8x32xf32>
    %15 = tpu.matmul %1, %3, %cst {dimension_numbers = #tpu.dot_dimension_numbers<[1], [0], [0], [1], [0, 0, 1, 1], [], []>} : vector<8x60xf32>, vector<60x32xf32>, vector<8x32xf32> -> vector<8x32xf32>
    %16 = vector.broadcast %9 : vector<1x32xf32> to vector<8x32xf32>
    %17 = arith.addf %15, %16 : vector<8x32xf32>
    %cst_14 = arith.constant 0.000000e+00 : f32
    %18 = vector.broadcast %cst_14 : f32 to vector<8x32xf32>
    %19 = arith.maximumf %17, %18 : vector<8x32xf32>
    %cst_15 = arith.constant dense<0.000000e+00> : vector<8x32xf32>
    %20 = tpu.matmul %19, %4, %cst_15 {dimension_numbers = #tpu.dot_dimension_numbers<[1], [0], [0], [1], [0, 0, 1, 1], [], []>} : vector<8x32xf32>, vector<32x32xf32>, vector<8x32xf32> -> vector<8x32xf32>
    %21 = vector.broadcast %10 : vector<1x32xf32> to vector<8x32xf32>
    %22 = arith.addf %20, %21 : vector<8x32xf32>
    %cst_16 = arith.constant 0.000000e+00 : f32
    %23 = vector.broadcast %cst_16 : f32 to vector<8x32xf32>
    %24 = arith.maximumf %22, %23 : vector<8x32xf32>
    %cst_17 = arith.constant dense<0.000000e+00> : vector<8x16xf32>
    %25 = tpu.matmul %24, %5, %cst_17 {dimension_numbers = #tpu.dot_dimension_numbers<[1], [0], [0], [1], [0, 0, 1, 1], [], []>} : vector<8x32xf32>, vector<32x16xf32>, vector<8x16xf32> -> vector<8x16xf32>
    %26 = vector.broadcast %11 : vector<1x16xf32> to vector<8x16xf32>
    %27 = arith.addf %25, %26 : vector<8x16xf32>
    %28 = vector.extract_strided_slice %27 {offsets = [0, 0], sizes = [8, 8], strides = [1, 1]} : vector<8x16xf32> to vector<8x8xf32>
    %29 = vector.extract_strided_slice %27 {offsets = [0, 8], sizes = [8, 8], strides = [1, 1]} : vector<8x16xf32> to vector<8x8xf32>
    %cst_18 = arith.constant 5.000000e-01 : f32
    %30 = vector.broadcast %cst_18 : f32 to vector<8x8xf32>
    %31 = arith.mulf %30, %29 : vector<8x8xf32>
    %32 = math.exp %31 : vector<8x8xf32>
    %33 = arith.mulf %2, %32 : vector<8x8xf32>
    %34 = arith.addf %28, %33 : vector<8x8xf32>
    %cst_19 = arith.constant dense<0.000000e+00> : vector<8x16xf32>
    %35 = tpu.matmul %34, %6, %cst_19 {dimension_numbers = #tpu.dot_dimension_numbers<[1], [0], [0], [1], [0, 0, 1, 1], [], []>} : vector<8x8xf32>, vector<8x16xf32>, vector<8x16xf32> -> vector<8x16xf32>
    %36 = vector.broadcast %12 : vector<1x16xf32> to vector<8x16xf32>
    %37 = arith.addf %35, %36 : vector<8x16xf32>
    %cst_20 = arith.constant 0.000000e+00 : f32
    %38 = vector.broadcast %cst_20 : f32 to vector<8x16xf32>
    %39 = arith.maximumf %37, %38 : vector<8x16xf32>
    %cst_21 = arith.constant dense<0.000000e+00> : vector<8x32xf32>
    %40 = tpu.matmul %39, %7, %cst_21 {dimension_numbers = #tpu.dot_dimension_numbers<[1], [0], [0], [1], [0, 0, 1, 1], [], []>} : vector<8x16xf32>, vector<16x32xf32>, vector<8x32xf32> -> vector<8x32xf32>
    %41 = vector.broadcast %13 : vector<1x32xf32> to vector<8x32xf32>
    %42 = arith.addf %40, %41 : vector<8x32xf32>
    %cst_22 = arith.constant 0.000000e+00 : f32
    %43 = vector.broadcast %cst_22 : f32 to vector<8x32xf32>
    %44 = arith.maximumf %42, %43 : vector<8x32xf32>
    %cst_23 = arith.constant dense<0.000000e+00> : vector<8x60xf32>
    %45 = tpu.matmul %44, %8, %cst_23 {dimension_numbers = #tpu.dot_dimension_numbers<[1], [0], [0], [1], [0, 0, 1, 1], [], []>} : vector<8x32xf32>, vector<32x60xf32>, vector<8x60xf32> -> vector<8x60xf32>
    %46 = vector.broadcast %14 : vector<1x60xf32> to vector<8x60xf32>
    %47 = arith.addf %45, %46 : vector<8x60xf32>
    %cst_24 = arith.constant 0.000000e+00 : f32
    %48 = vector.broadcast %cst_24 : f32 to vector<8x60xf32>
    %49 = arith.maximumf %47, %48 : vector<8x60xf32>
    %c0_25 = arith.constant 0 : index
    %c0_26 = arith.constant 0 : index
    %50 = vector.load %arg3[%c0_25, %c0_26] : memref<8x76xf32, #tpu.memory_space<vmem>>, vector<8x60xf32>
    tpu.vector_store %arg3[%c0_25, %c0_26], %49 {strides = array<i32>} : memref<8x76xf32, #tpu.memory_space<vmem>>, vector<8x60xf32>,
    %c0_27 = arith.constant 0 : index
    %c60 = arith.constant 60 : index
    %51 = vector.load %arg3[%c0_27, %c60] : memref<8x76xf32, #tpu.memory_space<vmem>>, vector<8x16xf32>
    tpu.vector_store %arg3[%c0_27, %c60], %27 {strides = array<i32>} : memref<8x76xf32, #tpu.memory_space<vmem>>, vector<8x16xf32>,
    return
  }
  func.func @transform_0(%arg0: i32) -> (i32, i32) {
    %c0_i32 = arith.constant 0 : i32
    %c0_i32_0 = arith.constant 0 : i32
    return %arg0, %c0_i32 : i32, i32
  }
  func.func @transform_1(%arg0: i32) -> (i32, i32) {
    %c0_i32 = arith.constant 0 : i32
    %c0_i32_0 = arith.constant 0 : i32
    %c0_i32_1 = arith.constant 0 : i32
    return %c0_i32, %c0_i32_0 : i32, i32
  }
  func.func @transform_2(%arg0: i32) -> (i32, i32) {
    %c0_i32 = arith.constant 0 : i32
    %c0_i32_0 = arith.constant 0 : i32
    return %arg0, %c0_i32 : i32, i32
  }
}

</mosaic_0001>

<bundles_post_ra>
// kernel: fcvae_forward.1
= control target key start
LH: loop header
LB: loop body
LE: loop exit
PB: predicated region body
PF: predicated region fallthrough
CT: control target
= control target key end

     0   :  { %7 = vsyncpa [#allocation3], 0  ;;  %s693_s9 = smov [#allocation2]   ;;  %s768_s0 = inlined_call_operand.vmem [shape: f32[8,68], index: 0, kind: input, shape index: {}]   ;;  %s769_s1 = inlined_call_operand.hbm [shape: f32[192,128], index: 1, kind: input, shape index: {}]   ;;  %s770_s2 = inlined_call_operand.vmem [shape: f32[8,76], index: 2, kind: output, shape index: {}]  }
   0x1   :  { %s15_s10 = sshll.u32 %s693_s9, 4  ;;  %s16_s10 = int_to_ptr.vmem [resolvable:$true] %s15_s10 }
   0x2   :  { %s679_s11 = scalar_lea.vmem %s16_s10, 3072  ;;  %p684_p1 = scmp.lt.s32.totalorder %s16_s10, %s16_s10 }
   0x3   :  { %p680_p0 = scmp.ne.s32.totalorder %s16_s10, %s679_s11  ;;  %p685_p2 = scmp.lt.s32.totalorder %s679_s11, %s679_s11 }
   0x5   :  { %p686_p3 = por %p685_p2, %p684_p1 }
   0x7   :  { %p687_p4 = pnand %p686_p3, %p680_p0 }
   0x9   :  { %690 = shalt.err (!%p687_p4)
}
   0xa   :  { %s694_s12 = smov 128   ;;  %s695_s13 = smov 8  }
   0xb   :  { %21 = dma.hbm_to_vmem [thread:$0]  %s769_s1, 3072, %s16_s10, [#allocation3], %s694_s12, %s694_s12, %s695_s13  }
   0xc   :  { %691 = dma.done.wait [#allocation3], 3072  }
   0xd   :  { %692 = vsyncadd [#allocation3], 4294964224  ;;  %v696_v0 = vmov 0.0   ;;  %vm697_vm0 = vmmov 0   ;;  %vm63_vm1 = vcmask 1043456   ;;  %v32_v2 = vld [vmem:[#allocation2 + $0x30] sm:$0xff] }
   0xe   :  { %597 = vmatprep.subr.mxu0 %v696_v0  ;;  %613 = vmatprep.mubr.msk.f32.mxu0 %vm697_vm0, %v696_v0  ;;  %v33_v1 = vld [vmem:[#allocation2 + $0x38] sm:$0xf]  ;;  %v31_v3 = vld [vmem:[#allocation2 + $0x28] sm:$0xff]  ;;  %v30_v5 = vld [vmem:[#allocation2 + $0x20] sm:$0xff]  ;;  %vm59_vm2 = vcmask 490496   ;;  %vm142_vm3 = vcmask 261120  }
   0xf   :  { %616 = vmatprep.subr.mxu1 %v696_v0  ;;  %624 = vmatprep.mubr.msk.f32.mxu1 %vm697_vm0, %v696_v0  ;;  %v37_v4 = vld [vmem:[#allocation2 + $0x58] sm:$0xff]  ;;  %v28_v7 = vld [vmem:[#allocation2 + $0x10] sm:$0xff]  ;;  %v27_v8 = vld [vmem:[#allocation2 + $0x8] sm:$0xff]  ;;  %s699_s17 = smov 52   ;;  %s700_s18 = smov 68   ;;  %vm311_vm4 = vcmask 64512  }
  0x10   :  { %598 = vmatpush3.msk.msra.mxu0 %vm63_vm1, %v33_v1  ;;  %617 = vmatpush3.msra.mxu1 %v37_v4  ;;  %v29_v6 = vld [vmem:[#allocation2 + $0x18] sm:$0xff]  ;;  %v26_v9 = vld [vmem:[#allocation2] sm:$0xff]  ;;  %v36_v11 = vld [vmem:[#allocation2 + $0x50] sm:$0xff]  ;;  %vm390_vm5 = vcmask 130048   ;;  %vm548_vm6 = vcmask 622048  }
  0x11   :  { %599 = vmatprep.subr.mxu0 %v696_v0  ;;  %618 = vmatprep.subr.mxu1 %v696_v0  ;;  %v25_v10 = vld [vmem:[%s768_s0] sm:$0xff]  ;;  %v35_v12 = vld [vmem:[#allocation2 + $0x48] sm:$0xff]  ;;  %v555_v14 = vld [vmem:[#allocation2 + $0xb8] ss:$0 sm:$0xff]  ;;  %s698_s0 = smov 60  }
  0x12   :  { %600 = vmatpush3.msra.mxu0 %v32_v2  ;;  %619 = vmatpush3.msra.mxu1 %v36_v11  ;;  %v34_v13 = vld [vmem:[#allocation2 + $0x40] sm:$0xff]  ;;  %v41_v19 = vld [vmem:[#allocation2 + $0x78] sm:$0xff]  ;;  %v40_v20 = vld [vmem:[#allocation2 + $0x70] sm:$0xff] }
  0x13   :  { %601 = vmatprep.subr.mxu0 %v696_v0  ;;  %620 = vmatprep.subr.mxu1 %v696_v0  ;;  %v39_v21 = vld [vmem:[#allocation2 + $0x68] sm:$0xff]  ;;  %v38_v22 = vld [vmem:[#allocation2 + $0x60] sm:$0xff]  ;;  %v558_v23 = vld [vmem:[#allocation2 + $0xb9] ss:$0 sm:$0xff] }
  0x14   :  { %602 = vmatpush3.msra.mxu0 %v31_v3  ;;  %621 = vmatpush3.msra.mxu1 %v35_v12  ;;  %v560_v28 = vld [vmem:[#allocation2 + $0xba] ss:$0 sm:$0xff]  ;;  %v42_v34 = vld [vmem:[#allocation2 + $0x80] sm:$0xff]  ;;  %v44_v40 = vld [vmem:[#allocation2 + $0x90] sm:$0xff] }
  0x15   :  { %603 = vmatprep.subr.mxu0 %v696_v0  ;;  %622 = vmatprep.subr.mxu1 %v696_v0  ;;  %v43_v41 = vld [vmem:[#allocation2 + $0x88] sm:$0xff]  ;;  %v48_v42 = vld [vmem:[#allocation2 + $0xb0] sm:$0xff]  ;;  %v562_v43 = vld [vmem:[#allocation2 + $0xbb] ss:$0 sm:$0xff] }
  0x16   :  { %604 = vmatpush3.msra.mxu0 %v30_v5  ;;  %623 = vmatpush3.msra.mxu1 %v34_v13  ;;  %v47_v48 = vld [vmem:[#allocation2 + $0xa8] sm:$0xff]  ;;  %v46_v49 = vld [vmem:[#allocation2 + $0xa0] sm:$0xff]  ;;  %v45_v50 = vld [vmem:[#allocation2 + $0x98] sm:$0xff] }
  0x17   :  { %605 = vmatprep.subr.mxu0 %v696_v0  ;;  %627 = vmatprep.subr.mxu1 %v696_v0  ;;  %v564_v51 = vld [vmem:[#allocation2 + $0xbc] ss:$0 sm:$0xff]  ;;  %v566_v56 = vld [vmem:[#allocation2 + $0xbd] ss:$0 sm:$0xff] }
  0x18   :  { %606 = vmatpush3.msra.mxu0 %v29_v6 }
  0x19   :  { %607 = vmatprep.subr.mxu0 %v696_v0 }
  0x1a   :  { %608 = vmatpush3.msra.mxu0 %v28_v7 }
  0x1b   :  { %609 = vmatprep.subr.mxu0 %v696_v0 }
  0x1c   :  { %610 = vmatpush3.msra.mxu0 %v27_v8 }
  0x1d   :  { %611 = vmatprep.subr.mxu0 %v696_v0 }
  0x1e   :  { %612 = vmatpush3.msra.mxu0 %v26_v9 }
  0x1f   :  { %614 = vmatmul.mubr.msk.f32.vlgmr.msra.gmra.mxu0 %vm59_vm2, %v25_v10  ;;  %650 = vmatprep.subr.mxu0 %v696_v0 }
  0x20   :  { %658 = vmatprep.mubr.msk.f32.mxu0 %vm697_vm0, %v696_v0  ;;  %651 = vmatpush3.msra.mxu0 %v48_v42 }
  0x21   :  { %652 = vmatprep.subr.mxu0 %v696_v0 }
  0x22   :  { %653 = vmatpush3.msra.mxu0 %v47_v48 }
  0x23   :  { %654 = vmatprep.subr.mxu0 %v696_v0 }
  0x24   :  { %655 = vmatpush3.msra.mxu0 %v46_v49 }
  0x25   :  { %656 = vmatprep.subr.mxu0 %v696_v0 }
  0x26   :  { %657 = vmatpush3.msra.mxu0 %v45_v50 }
  0xdf   :  { %v133_v15 = vpop.f32.mrf.mxu0 }
  0xe0   :  { %v134_v16 = vadd.f32 %v555_v14, %v133_v15 }
  0xe1   :  { %v615_v17 = vpop.f32.mrf.mxu0 }
  0xe2   :  { %v137_v18 = vmax.f32 %v134_v16, 0.0 }
  0xe4   :  { %625 = vmatmul.mubr.msk.f32.vlgmr.msra.gmra.mxu1 %vm142_vm3, %v137_v18 }
  0xe5   :  { %628 = vmatpush3.msra.mxu1 %v41_v19  ;;  %635 = vmatprep.mubr.msk.f32.mxu1 %vm697_vm0, %v696_v0 }
  0xe6   :  { %629 = vmatprep.subr.mxu1 %v696_v0 }
  0xe7   :  { %630 = vmatpush3.msra.mxu1 %v40_v20 }
  0xe8   :  { %631 = vmatprep.subr.mxu1 %v696_v0 }
  0xe9   :  { %632 = vmatpush3.msra.mxu1 %v39_v21 }
  0xea   :  { %633 = vmatprep.subr.mxu1 %v696_v0 }
  0xeb   :  { %634 = vmatpush3.msra.mxu1 %v38_v22 }
  0xec   :  { %638 = vmatprep.subr.mxu1 %v696_v0 }
 0x1a4   :  { %v212_v24 = vpop.f32.mrf.mxu1 }
 0x1a5   :  { %v213_v25 = vadd.f32 %v558_v23, %v212_v24 }
 0x1a6   :  { %v626_v26 = vpop.f32.mrf.mxu1 }
 0x1a7   :  { %v216_v27 = vmax.f32 %v213_v25, 0.0 }
 0x1a9   :  { %636 = vmatmul.mubr.msk.f32.vlgmr.msra.gmra.mxu1 %vm142_vm3, %v216_v27 }
 0x1aa   :  { %640 = vmatprep.mubr.msk.f32.mxu1 %vm697_vm0, %v696_v0  ;;  %639 = vmatpush3.msra.mxu1 %v42_v34 }
 0x1ab   :  { %643 = vmatprep.subr.mxu1 %v696_v0 }
 0x269   :  { %v290_v29 = vpop.f32.mrf.mxu1 }
 0x26a   :  { %v291_v30 = vadd.f32 %v560_v28, %v290_v29 }
 0x26b   :  { %v637_v31 = vpop.f32.mrf.mxu1 }
 0x26c   :  { %v294_v32 = vmul.f32 0.5, %v291_v30  ;;  %545 = vrot.lane.b32.xlu1 %v291_v30, %s698_s0 }
 0x26e   :  { %v295_v33 = vmul.f32 1.442695, %v294_v32 }
 0x270   :  { %669 = vpow2.f32 %v295_v33 }
 0x27d   :  { %v670_v35 = vpop.eup %669 }
 0x27e   :  { %298 = vrot.lane.b32.xlu0 %v670_v35, %s699_s17 }
 0x2de   :  { %v546_v61 = vpop.permute.xlu1 %545 }
 0x2f0   :  { %v299_v36 = vpop.permute.xlu0 %298 }
 0x2f1   :  { %v301_v37 = vmul.f32 %v299_v36, %v25_v10 }
 0x2f3   :  { %303 = vrot.lane.b32.xlu0 %v301_v37, %s700_s18 }
 0x365   :  { %v304_v38 = vpop.permute.xlu0 %303 }
 0x366   :  { %v306_v39 = vadd.f32 %v304_v38, %v291_v30 }
 0x368   :  { %641 = vmatmul.mubr.msk.f32.vlgmr.msra.gmra.mxu1 %vm311_vm4, %v306_v39 }
 0x369   :  { %647 = vmatprep.mubr.msk.f32.mxu1 %vm697_vm0, %v696_v0  ;;  %644 = vmatpush3.msra.mxu1 %v44_v40 }
 0x36a   :  { %645 = vmatprep.subr.mxu1 %v696_v0 }
 0x36b   :  { %646 = vmatpush3.msra.mxu1 %v43_v41 }
 0x428   :  { %v381_v44 = vpop.f32.mrf.mxu1 }
 0x429   :  { %v382_v45 = vadd.f32 %v562_v43, %v381_v44 }
 0x42a   :  { %v642_v46 = vpop.f32.mrf.mxu1 }
 0x42b   :  { %v385_v47 = vmax.f32 %v382_v45, 0.0 }
 0x42d   :  { %648 = vmatmul.mubr.msk.f32.vlgmr.msra.gmra.mxu1 %vm390_vm5, %v385_v47 }
 0x4ed   :  { %v460_v52 = vpop.f32.mrf.mxu1 }
 0x4ee   :  { %v461_v53 = vadd.f32 %v564_v51, %v460_v52 }
 0x4ef   :  { %v649_v54 = vpop.f32.mrf.mxu1 }
 0x4f0   :  { %v464_v55 = vmax.f32 %v461_v53, 0.0 }
 0x4f2   :  { %659 = vmatmul.mubr.msk.f32.vlgmr.msra.gmra.mxu0 %vm142_vm3, %v464_v55 }
 0x5b2   :  { %v538_v57 = vpop.f32.mrf.mxu0 }
 0x5b3   :  { %v539_v58 = vadd.f32 %v566_v56, %v538_v57 }
 0x5b4   :  { %v660_v59 = vpop.f32.mrf.mxu0 }
 0x5b5   :  { %v542_v60 = vmax.f32 %v539_v58, 0.0 }
 0x5b7   :  { %543 = vst.msk [vmem:[%s770_s2] sm:$0xff] %vm59_vm2, %v542_v60 }
 0x5b8   :  { %549 = vst.msk [vmem:[%s770_s2] sm:$0xff] %vm548_vm6, %v546_v61 }
 0x5b9   :  { %554 = vsyncpa [#allocation3], 1 }

</bundles_post_ra>
